<compile_context>
chip_gen: v7x
topology: tpu7x:2x2x1
jax: 0.10.0
libtpu: 0.0.40
codegen_flags: <defaults>
</compile_context>

<pallas_src>
import jax
import jax.numpy as jnp
from jax.experimental import pallas as pl
from jax.experimental.pallas import tpu as pltpu

HIDDEN = 128      # stands in for BERT hidden_size (768)
VIS_OUT = 256     # stands in for resnet50.fc.out_features (1000)
NUM_CLASS = 8     # config['setting']['num_class']
PAD_C = 128       # lane-dense padded class dimension


# ----------------------------- Pallas kernels ------------------------------

def _head_body(x_ref, wa_ref, ba_ref, wb_ref, bb_ref):
    # y = relu(x @ Wa + ba) @ Wb + bb   (bf16 MXU operands, fp32 accumulate/elementwise)
    x = x_ref[...].astype(jnp.bfloat16)
    h = jnp.dot(x, wa_ref[...], preferred_element_type=jnp.float32) + ba_ref[...]
    h = jnp.maximum(h, 0.0)
    return jnp.dot(h.astype(jnp.bfloat16), wb_ref[...],
                   preferred_element_type=jnp.float32) + bb_ref[...]


def _head_kernel(x_ref, wa_ref, ba_ref, wb_ref, bb_ref, out_ref):
    # cls_t / cls_i (folded): lane-dense padded logits (TILE_B, PAD_C)
    out_ref[...] = _head_body(x_ref, wa_ref, ba_ref, wb_ref, bb_ref)


def _fused_test_kernel(xt_ref, xi_ref,
                       t_wa_ref, t_ba_ref, t_wb_ref, t_bb_ref,
                       i_wa_ref, i_ba_ref, i_wb_ref, i_bb_ref,
                       out_ref):
    # (softmax(cls_t(text), dim=1) + softmax(cls_i(image), dim=1)) / 2, all in one launch.
    logits_t = _head_body(xt_ref, t_wa_ref, t_ba_ref, t_wb_ref, t_bb_ref)
    logits_i = _head_body(xi_ref, i_wa_ref, i_ba_ref, i_wb_ref, i_bb_ref)

    lane = jax.lax.broadcasted_iota(jnp.int32, logits_t.shape, dimension=1)
    valid = lane < NUM_CLASS        # mask padded class lanes

    def _softmax(z):
        z = jnp.where(valid, z, jnp.float32(-1e30))
        z = z - jnp.max(z, axis=1, keepdims=True)
        e = jnp.where(valid, jnp.exp(z), 0.0)
        return e * pl.reciprocal(jnp.sum(e, axis=1, keepdims=True), approx=True)

    out_ref[...] = (_softmax(logits_t) + _softmax(logits_i)) * 0.5


# ------------------------------ call wrappers -------------------------------

def _pick_tile_b(b):
    # biggest batch tile that divides B (weights are tiny, batch tile dominates VMEM;
    # keep well under the v7x 32 MiB scoped-VMEM default)
    for t in (1024, 512, 256, 128, 64, 32, 16, 8):
        if b % t == 0:
            return t
    return b  # small / odd batch: one block covering the full batch


def _weight_spec(w):
    return pl.BlockSpec(w.shape, lambda i: (0, 0))   # VMEM-resident across batch tiles


def _run_head(x, wa, ba, wb, bb):
    b, d_in = x.shape
    tb = _pick_tile_b(b)
    padded = pl.pallas_call(
        _head_kernel,
        out_shape=jax.ShapeDtypeStruct((b, PAD_C), jnp.float32),
        grid=(b // tb,),
        in_specs=[
            pl.BlockSpec((tb, d_in), lambda i: (i, 0)),
            _weight_spec(wa), _weight_spec(ba),
            _weight_spec(wb), _weight_spec(bb),
        ],
        out_specs=pl.BlockSpec((tb, PAD_C), lambda i: (i, 0)),
        compiler_params=pltpu.CompilerParams(dimension_semantics=("parallel",)),
    )(x, wa, ba, wb, bb)
    return padded[:, :NUM_CLASS]


def cls_t(params, text_embeds):
    return _run_head(text_embeds, params["t_wa"], params["t_ba"],
                     params["t_wb"], params["t_bb"])


def cls_i(params, image_embeds):
    return _run_head(image_embeds, params["i_wa"], params["i_ba"],
                     params["i_wb"], params["i_bb"])


def fused_test(params, text_embeds, image_embeds):
    b = text_embeds.shape[0]
    tb = _pick_tile_b(b)
    padded = pl.pallas_call(
        _fused_test_kernel,
        out_shape=jax.ShapeDtypeStruct((b, PAD_C), jnp.float32),
        grid=(b // tb,),
        in_specs=[
            pl.BlockSpec((tb, HIDDEN), lambda i: (i, 0)),
            pl.BlockSpec((tb, VIS_OUT), lambda i: (i, 0)),
            _weight_spec(params["t_wa"]), _weight_spec(params["t_ba"]),
            _weight_spec(params["t_wb"]), _weight_spec(params["t_bb"]),
            _weight_spec(params["i_wa"]), _weight_spec(params["i_ba"]),
            _weight_spec(params["i_wb"]), _weight_spec(params["i_bb"]),
        ],
        out_specs=pl.BlockSpec((tb, PAD_C), lambda i: (i, 0)),
        compiler_params=pltpu.CompilerParams(dimension_semantics=("parallel",)),
    )(text_embeds, image_embeds,
      params["t_wa"], params["t_ba"], params["t_wb"], params["t_bb"],
      params["i_wa"], params["i_ba"], params["i_wb"], params["i_bb"])
    return padded[:, :NUM_CLASS]


# -------------------------- encoder stubs (glue) ----------------------------
# TODO(synk): BertModel.from_pretrained('checkpoint/bert') is a pretrained transformer
# backbone with no in-script equivalent; stand-in does a deterministic token embedding
# lookup and takes last_hidden_state[:, 0, :] (the CLS position) as forward() does.
def text_encoder_stub(params, input_ids):
    emb = params["tok_emb"][input_ids]          # (B, S, HIDDEN)
    return emb[:, 0, :]                         # (B, HIDDEN)


# TODO(synk): torchvision resnet50 + checkpoint load cannot be reproduced; stand-in does a
# global average pool over NCHW spatial dims and a deterministic linear projection to
# VIS_OUT features (the shape the resnet fc head would produce).
def visual_encoder_stub(params, image):
    pooled = jnp.mean(image, axis=(2, 3))       # (B, C)
    return pooled @ params["vis_proj"]          # (B, VIS_OUT)


# ------------------------------ parameter init -------------------------------

def _pad_cols(a, width=PAD_C):
    return jnp.pad(a, ((0, 0), (0, width - a.shape[-1])))


def init_params(key):
    ks = jax.random.split(key, 10)
    scale = 0.02

    def w(k, shape):
        return (scale * jax.random.normal(k, shape)).astype(jnp.float32)

    def b(shape):
        return jnp.zeros(shape, jnp.float32)

    # raw PyTorch-equivalent Linear weights (x @ W + b layout)
    raw = {
        # cls_t: Linear(HIDDEN,256), ReLU, Linear(256,64), Linear(64,NUM_CLASS)
        "t_w1": w(ks[2], (HIDDEN, 256)),  "t_b1": b((1, 256)),
        "t_w2": w(ks[3], (256, 64)),      "t_b2": b((1, 64)),
        "t_w3": w(ks[4], (64, NUM_CLASS)), "t_b3": b((1, NUM_CLASS)),
        # cls_i: Linear(VIS_OUT,HIDDEN), Linear(HIDDEN,256), ReLU, Linear(256,64), Linear(64,NUM_CLASS)
        "i_w0": w(ks[5], (VIS_OUT, HIDDEN)), "i_b0": b((1, HIDDEN)),
        "i_w1": w(ks[6], (HIDDEN, 256)),     "i_b1": b((1, 256)),
        "i_w2": w(ks[7], (256, 64)),         "i_b2": b((1, 64)),
        "i_w3": w(ks[8], (64, NUM_CLASS)),   "i_b3": b((1, NUM_CLASS)),
    }

    # --- fold activation-free Linear pairs once (exact algebra; fp32 rounding ~1e-6) ---
    t_wa = raw["t_w1"]
    t_ba = raw["t_b1"]
    t_wb = raw["t_w2"] @ raw["t_w3"]                       # (256, NUM_CLASS)
    t_bb = raw["t_b2"] @ raw["t_w3"] + raw["t_b3"]         # (1, NUM_CLASS)

    i_wa = raw["i_w0"] @ raw["i_w1"]                       # (VIS_OUT, 256)
    i_ba = raw["i_b0"] @ raw["i_w1"] + raw["i_b1"]         # (1, 256)
    i_wb = raw["i_w2"] @ raw["i_w3"]                       # (256, NUM_CLASS)
    i_bb = raw["i_b2"] @ raw["i_w3"] + raw["i_b3"]         # (1, NUM_CLASS)

    return {
        # stub encoders (plain-JAX glue)
        "tok_emb": w(ks[0], (1000, HIDDEN)),
        "vis_proj": w(ks[1], (3, VIS_OUT)),
        # folded + lane-padded inference weights (bf16 MXU operands, fp32 biases)
        "t_wa": t_wa.astype(jnp.bfloat16),            "t_ba": t_ba,
        "t_wb": _pad_cols(t_wb).astype(jnp.bfloat16), "t_bb": _pad_cols(t_bb),
        "i_wa": i_wa.astype(jnp.bfloat16),            "i_ba": i_ba,
        "i_wb": _pad_cols(i_wb).astype(jnp.bfloat16), "i_bb": _pad_cols(i_bb),
    }


# --------------------------------- forward -----------------------------------

def forward(params, input_list):
    text_input_ids, image, state = input_list

    if state == "train_text":
        text_embeds = text_encoder_stub(params, text_input_ids)
        return text_embeds, cls_t(params, text_embeds)

    if state == "train_image":
        image_embeds = visual_encoder_stub(params, image)
        return image_embeds, cls_i(params, image_embeds)

    if state == "test_text":
        return cls_t(params, text_encoder_stub(params, text_input_ids))

    if state == "test_image":
        return cls_i(params, visual_encoder_stub(params, image))

    if state == "test":
        text_embeds = text_encoder_stub(params, text_input_ids)
        image_embeds = visual_encoder_stub(params, image)
        return fused_test(params, text_embeds, image_embeds)   # single pallas_call

    raise ValueError(f"unknown state: {state}")


# ----------------------------------- main ------------------------------------

if __name__ == "__main__":
    key = jax.random.PRNGKey(0)
    k_params, k_ids, k_img = jax.random.split(key, 3)

    params = init_params(k_params)

    batch, seq = 2, 8
    input_ids = jax.random.randint(k_ids, (batch, seq), 0, 1000, dtype=jnp.int32)
    image = jax.random.normal(k_img, (batch, 3, 16, 16), dtype=jnp.float32)  # NCHW

    # fused 'test' branch (cls_t + cls_i + softmax fusion in ONE kernel)
    out = forward(params, (input_ids, image, "test"))
    out = jax.block_until_ready(out)
    assert out.shape == (batch, NUM_CLASS)

    # plain-JAX reference of the same folded math (loose tol: bf16 MXU operands)
    te = text_encoder_stub(params, input_ids)
    ie = visual_encoder_stub(params, image)

    def ref_head(x, wa, ba, wb, bb):
        h = jnp.maximum(x @ wa.astype(jnp.float32) + ba, 0.0)
        return (h @ wb.astype(jnp.float32) + bb)[:, :NUM_CLASS]

    lt = ref_head(te, params["t_wa"], params["t_ba"], params["t_wb"], params["t_bb"])
    li = ref_head(ie, params["i_wa"], params["i_ba"], params["i_wb"], params["i_bb"])
    ref = (jax.nn.softmax(lt, axis=1) + jax.nn.softmax(li, axis=1)) * 0.5
    assert jnp.allclose(out, ref, atol=1e-2), (out, ref)

    # exercise the training / single-modality branches once
    _, logits_t = forward(params, (input_ids, image, "train_text"))
    _, logits_i = forward(params, (input_ids, image, "train_image"))
    jax.block_until_ready((logits_t, logits_i))
    assert logits_t.shape == (batch, NUM_CLASS)
    assert logits_i.shape == (batch, NUM_CLASS)

    print("KERNEL_OK")
</pallas_src>

<mosaic_0001>
module attributes {stable_mosaic.version = 11 : i64} {
  func.func @_fused_test_kernel(%arg0: i32, %arg1: memref<2x128xf32, #tpu.memory_space<vmem>>, %arg2: memref<2x256xf32, #tpu.memory_space<vmem>>, %arg3: memref<128x256xbf16, #tpu.memory_space<vmem>>, %arg4: memref<1x256xf32, #tpu.memory_space<vmem>>, %arg5: memref<256x128xbf16, #tpu.memory_space<vmem>>, %arg6: memref<1x128xf32, #tpu.memory_space<vmem>>, %arg7: memref<256x256xbf16, #tpu.memory_space<vmem>>, %arg8: memref<1x256xf32, #tpu.memory_space<vmem>>, %arg9: memref<256x128xbf16, #tpu.memory_space<vmem>>, %arg10: memref<1x128xf32, #tpu.memory_space<vmem>>, %arg11: memref<2x128xf32, #tpu.memory_space<vmem>>) attributes {dimension_semantics = [#tpu.dimension_semantics<parallel>], iteration_bounds = array<i64: 1>, scalar_prefetch = 0 : i64, scratch_operands = 0 : i64, tpu.core_type = #tpu.core_type<tc>, window_params = [{transform_indices = @transform_0, window_bounds = array<i64: 2, 128>}, {transform_indices = @transform_1, window_bounds = array<i64: 2, 256>}, {pipeline_mode = #tpu.pipeline_mode<synchronous>, transform_indices = @transform_2, window_bounds = array<i64: 128, 256>}, {pipeline_mode = #tpu.pipeline_mode<synchronous>, transform_indices = @transform_3, window_bounds = array<i64: 1, 256>}, {pipeline_mode = #tpu.pipeline_mode<synchronous>, transform_indices = @transform_4, window_bounds = array<i64: 256, 128>}, {pipeline_mode = #tpu.pipeline_mode<synchronous>, transform_indices = @transform_5, window_bounds = array<i64: 1, 128>}, {pipeline_mode = #tpu.pipeline_mode<synchronous>, transform_indices = @transform_6, window_bounds = array<i64: 256, 256>}, {pipeline_mode = #tpu.pipeline_mode<synchronous>, transform_indices = @transform_7, window_bounds = array<i64: 1, 256>}, {pipeline_mode = #tpu.pipeline_mode<synchronous>, transform_indices = @transform_8, window_bounds = array<i64: 256, 128>}, {pipeline_mode = #tpu.pipeline_mode<synchronous>, transform_indices = @transform_9, window_bounds = array<i64: 1, 128>}, {transform_indices = @transform_10, window_bounds = array<i64: 2, 128>}]} {
    %c0 = arith.constant 0 : index
    %c0_0 = arith.constant 0 : index
    %0 = vector.load %arg1[%c0, %c0_0] : memref<2x128xf32, #tpu.memory_space<vmem>>, vector<2x128xf32>
    %1 = arith.truncf %0 : vector<2x128xf32> to vector<2x128xbf16>
    %c0_1 = arith.constant 0 : index
    %c0_2 = arith.constant 0 : index
    %2 = vector.load %arg3[%c0_1, %c0_2] : memref<128x256xbf16, #tpu.memory_space<vmem>>, vector<128x256xbf16>
    %cst = arith.constant dense<0.000000e+00> : vector<2x256xf32>
    %3 = tpu.matmul %1, %2, %cst {dimension_numbers = #tpu.dot_dimension_numbers<[1], [0], [0], [1], [0, 0, 1, 1], [], []>} : vector<2x128xbf16>, vector<128x256xbf16>, vector<2x256xf32> -> vector<2x256xf32>
    %c0_3 = arith.constant 0 : index
    %c0_4 = arith.constant 0 : index
    %4 = vector.load %arg4[%c0_3, %c0_4] : memref<1x256xf32, #tpu.memory_space<vmem>>, vector<1x256xf32>
    %5 = vector.broadcast %4 : vector<1x256xf32> to vector<2x256xf32>
    %6 = arith.addf %3, %5 : vector<2x256xf32>
    %cst_5 = arith.constant 0.000000e+00 : f32
    %7 = vector.broadcast %cst_5 : f32 to vector<2x256xf32>
    %8 = arith.maximumf %6, %7 : vector<2x256xf32>
    %9 = arith.truncf %8 : vector<2x256xf32> to vector<2x256xbf16>
    %c0_6 = arith.constant 0 : index
    %c0_7 = arith.constant 0 : index
    %10 = vector.load %arg5[%c0_6, %c0_7] : memref<256x128xbf16, #tpu.memory_space<vmem>>, vector<256x128xbf16>
    %cst_8 = arith.constant dense<0.000000e+00> : vector<2x128xf32>
    %11 = tpu.matmul %9, %10, %cst_8 {dimension_numbers = #tpu.dot_dimension_numbers<[1], [0], [0], [1], [0, 0, 1, 1], [], []>} : vector<2x256xbf16>, vector<256x128xbf16>, vector<2x128xf32> -> vector<2x128xf32>
    %c0_9 = arith.constant 0 : index
    %c0_10 = arith.constant 0 : index
    %12 = vector.load %arg6[%c0_9, %c0_10] : memref<1x128xf32, #tpu.memory_space<vmem>>, vector<1x128xf32>
    %13 = vector.broadcast %12 : vector<1x128xf32> to vector<2x128xf32>
    %14 = arith.addf %11, %13 : vector<2x128xf32>
    %c0_11 = arith.constant 0 : index
    %c0_12 = arith.constant 0 : index
    %15 = vector.load %arg2[%c0_11, %c0_12] : memref<2x256xf32, #tpu.memory_space<vmem>>, vector<2x256xf32>
    %16 = arith.truncf %15 : vector<2x256xf32> to vector<2x256xbf16>
    %c0_13 = arith.constant 0 : index
    %c0_14 = arith.constant 0 : index
    %17 = vector.load %arg7[%c0_13, %c0_14] : memref<256x256xbf16, #tpu.memory_space<vmem>>, vector<256x256xbf16>
    %cst_15 = arith.constant dense<0.000000e+00> : vector<2x256xf32>
    %18 = tpu.matmul %16, %17, %cst_15 {dimension_numbers = #tpu.dot_dimension_numbers<[1], [0], [0], [1], [0, 0, 1, 1], [], []>} : vector<2x256xbf16>, vector<256x256xbf16>, vector<2x256xf32> -> vector<2x256xf32>
    %c0_16 = arith.constant 0 : index
    %c0_17 = arith.constant 0 : index
    %19 = vector.load %arg8[%c0_16, %c0_17] : memref<1x256xf32, #tpu.memory_space<vmem>>, vector<1x256xf32>
    %20 = vector.broadcast %19 : vector<1x256xf32> to vector<2x256xf32>
    %21 = arith.addf %18, %20 : vector<2x256xf32>
    %cst_18 = arith.constant 0.000000e+00 : f32
    %22 = vector.broadcast %cst_18 : f32 to vector<2x256xf32>
    %23 = arith.maximumf %21, %22 : vector<2x256xf32>
    %24 = arith.truncf %23 : vector<2x256xf32> to vector<2x256xbf16>
    %c0_19 = arith.constant 0 : index
    %c0_20 = arith.constant 0 : index
    %25 = vector.load %arg9[%c0_19, %c0_20] : memref<256x128xbf16, #tpu.memory_space<vmem>>, vector<256x128xbf16>
    %cst_21 = arith.constant dense<0.000000e+00> : vector<2x128xf32>
    %26 = tpu.matmul %24, %25, %cst_21 {dimension_numbers = #tpu.dot_dimension_numbers<[1], [0], [0], [1], [0, 0, 1, 1], [], []>} : vector<2x256xbf16>, vector<256x128xbf16>, vector<2x128xf32> -> vector<2x128xf32>
    %c0_22 = arith.constant 0 : index
    %c0_23 = arith.constant 0 : index
    %27 = vector.load %arg10[%c0_22, %c0_23] : memref<1x128xf32, #tpu.memory_space<vmem>>, vector<1x128xf32>
    %28 = vector.broadcast %27 : vector<1x128xf32> to vector<2x128xf32>
    %29 = arith.addf %26, %28 : vector<2x128xf32>
    %30 = tpu.iota {dimensions = array<i32: 1>} : vector<2x128xi32>
    %c8_i32 = arith.constant 8 : i32
    %31 = vector.broadcast %c8_i32 : i32 to vector<2x128xi32>
    %32 = arith.cmpi slt, %30, %31 : vector<2x128xi32>
    %cst_24 = arith.constant -1.000000e+30 : f32
    %33 = vector.broadcast %cst_24 : f32 to vector<2x128xf32>
    %34 = arith.select %32, %14, %33 : vector<2x128xi1>, vector<2x128xf32>
    %cst_25 = arith.constant dense<0xFF800000> : vector<2xf32>
    %35 = vector.multi_reduction <maximumf>, %34, %cst_25 [1] : vector<2x128xf32> to vector<2xf32>
    %36 = vector.shape_cast %35 : vector<2xf32> to vector<2x1xf32>
    %37 = vector.broadcast %36 : vector<2x1xf32> to vector<2x128xf32>
    %38 = arith.subf %34, %37 : vector<2x128xf32>
    %39 = math.exp %38 : vector<2x128xf32>
    %cst_26 = arith.constant 0.000000e+00 : f32
    %40 = vector.broadcast %cst_26 : f32 to vector<2x128xf32>
    %41 = arith.select %32, %39, %40 : vector<2x128xi1>, vector<2x128xf32>
    %cst_27 = arith.constant dense<0.000000e+00> : vector<2xf32>
    %42 = vector.multi_reduction <add>, %41, %cst_27 [1] : vector<2x128xf32> to vector<2xf32>
    %43 = vector.shape_cast %42 : vector<2xf32> to vector<2x1xf32>
    %44 = tpu.reciprocal %43 {approx = true} : vector<2x1xf32> -> vector<2x1xf32>
    %45 = vector.broadcast %44 : vector<2x1xf32> to vector<2x128xf32>
    %46 = arith.mulf %41, %45 : vector<2x128xf32>
    %cst_28 = arith.constant -1.000000e+30 : f32
    %47 = vector.broadcast %cst_28 : f32 to vector<2x128xf32>
    %48 = arith.select %32, %29, %47 : vector<2x128xi1>, vector<2x128xf32>
    %cst_29 = arith.constant dense<0xFF800000> : vector<2xf32>
    %49 = vector.multi_reduction <maximumf>, %48, %cst_29 [1] : vector<2x128xf32> to vector<2xf32>
    %50 = vector.shape_cast %49 : vector<2xf32> to vector<2x1xf32>
    %51 = vector.broadcast %50 : vector<2x1xf32> to vector<2x128xf32>
    %52 = arith.subf %48, %51 : vector<2x128xf32>
    %53 = math.exp %52 : vector<2x128xf32>
    %cst_30 = arith.constant 0.000000e+00 : f32
    %54 = vector.broadcast %cst_30 : f32 to vector<2x128xf32>
    %55 = arith.select %32, %53, %54 : vector<2x128xi1>, vector<2x128xf32>
    %cst_31 = arith.constant dense<0.000000e+00> : vector<2xf32>
    %56 = vector.multi_reduction <add>, %55, %cst_31 [1] : vector<2x128xf32> to vector<2xf32>
    %57 = vector.shape_cast %56 : vector<2xf32> to vector<2x1xf32>
    %58 = tpu.reciprocal %57 {approx = true} : vector<2x1xf32> -> vector<2x1xf32>
    %59 = vector.broadcast %58 : vector<2x1xf32> to vector<2x128xf32>
    %60 = arith.mulf %55, %59 : vector<2x128xf32>
    %61 = arith.addf %46, %60 : vector<2x128xf32>
    %cst_32 = arith.constant 5.000000e-01 : f32
    %62 = vector.broadcast %cst_32 : f32 to vector<2x128xf32>
    %63 = arith.mulf %61, %62 : vector<2x128xf32>
    %c0_33 = arith.constant 0 : index
    %c0_34 = arith.constant 0 : index
    %64 = vector.load %arg11[%c0_33, %c0_34] : memref<2x128xf32, #tpu.memory_space<vmem>>, vector<2x128xf32>
    tpu.vector_store %arg11[%c0_33, %c0_34], %63 {strides = array<i32>} : memref<2x128xf32, #tpu.memory_space<vmem>>, vector<2x128xf32>,
    return
  }
  func.func @transform_0(%arg0: i32) -> (i32, i32) {
    %c0_i32 = arith.constant 0 : i32
    %c0_i32_0 = arith.constant 0 : i32
    return %arg0, %c0_i32 : i32, i32
  }
  func.func @transform_1(%arg0: i32) -> (i32, i32) {
    %c0_i32 = arith.constant 0 : i32
    %c0_i32_0 = arith.constant 0 : i32
    return %arg0, %c0_i32 : i32, i32
  }
  func.func @transform_2(%arg0: i32) -> (i32, i32) {
    %c0_i32 = arith.constant 0 : i32
    %c0_i32_0 = arith.constant 0 : i32
    %c0_i32_1 = arith.constant 0 : i32
    return %c0_i32, %c0_i32_0 : i32, i32
  }
  func.func @transform_3(%arg0: i32) -> (i32, i32) {
    %c0_i32 = arith.constant 0 : i32
    %c0_i32_0 = arith.constant 0 : i32
    %c0_i32_1 = arith.constant 0 : i32
    return %c0_i32, %c0_i32_0 : i32, i32
  }
  func.func @transform_4(%arg0: i32) -> (i32, i32) {
    %c0_i32 = arith.constant 0 : i32
    %c0_i32_0 = arith.constant 0 : i32
    %c0_i32_1 = arith.constant 0 : i32
    return %c0_i32, %c0_i32_0 : i32, i32
  }
  func.func @transform_5(%arg0: i32) -> (i32, i32) {
    %c0_i32 = arith.constant 0 : i32
    %c0_i32_0 = arith.constant 0 : i32
    %c0_i32_1 = arith.constant 0 : i32
    return %c0_i32, %c0_i32_0 : i32, i32
  }
  func.func @transform_6(%arg0: i32) -> (i32, i32) {
    %c0_i32 = arith.constant 0 : i32
    %c0_i32_0 = arith.constant 0 : i32
    %c0_i32_1 = arith.constant 0 : i32
    return %c0_i32, %c0_i32_0 : i32, i32
  }
  func.func @transform_7(%arg0: i32) -> (i32, i32) {
    %c0_i32 = arith.constant 0 : i32
    %c0_i32_0 = arith.constant 0 : i32
    %c0_i32_1 = arith.constant 0 : i32
    return %c0_i32, %c0_i32_0 : i32, i32
  }
  func.func @transform_8(%arg0: i32) -> (i32, i32) {
    %c0_i32 = arith.constant 0 : i32
    %c0_i32_0 = arith.constant 0 : i32
    %c0_i32_1 = arith.constant 0 : i32
    return %c0_i32, %c0_i32_0 : i32, i32
  }
  func.func @transform_9(%arg0: i32) -> (i32, i32) {
    %c0_i32 = arith.constant 0 : i32
    %c0_i32_0 = arith.constant 0 : i32
    %c0_i32_1 = arith.constant 0 : i32
    return %c0_i32, %c0_i32_0 : i32, i32
  }
  func.func @transform_10(%arg0: i32) -> (i32, i32) {
    %c0_i32 = arith.constant 0 : i32
    %c0_i32_0 = arith.constant 0 : i32
    return %arg0, %c0_i32 : i32, i32
  }
}

</mosaic_0001>

<bundles_post_ra>
// kernel: tpu_custom_call.1
= control target key start
LH: loop header
LB: loop body
LE: loop exit
PB: predicated region body
PF: predicated region fallthrough
CT: control target
= control target key end

     0   :  { %15 = vsyncpa [#allocation3], 0  ;;  %s1555_s0 = inlined_call_operand.hbm [shape: f32[2,128], index: 0, kind: input, shape index: {}]   ;;  %s1556_s1 = inlined_call_operand.hbm [shape: f32[2,256], index: 1, kind: input, shape index: {}]   ;;  %s1557_s2 = inlined_call_operand.hbm [shape: bf16[128,256], index: 2, kind: input, shape index: {}]   ;;  %s1558_s3 = inlined_call_operand.vmem [shape: f32[1,256], index: 3, kind: input, shape index: {}]   ;;  %s1559_s4 = inlined_call_operand.hbm [shape: bf16[256,128], index: 4, kind: input, shape index: {}]   ;;  %s1560_s5 = inlined_call_operand.vmem [shape: f32[1,128], index: 5, kind: input, shape index: {}]   ;;  %s1561_s6 = inlined_call_operand.hbm [shape: bf16[256,256], index: 6, kind: input, shape index: {}]   ;;  %s1562_s7 = inlined_call_operand.vmem [shape: f32[1,256], index: 7, kind: input, shape index: {}]   ;;  %s1563_s8 = inlined_call_operand.hbm [shape: bf16[256,128], index: 8, kind: input, shape index: {}]   ;;  %s1564_s9 = inlined_call_operand.vmem [shape: f32[1,128], index: 9, kind: input, shape index: {}]   ;;  %s1565_s10 = inlined_call_operand.hbm [shape: f32[2,128], index: 10, kind: output, shape index: {}]  }
   0x1   :  { %16 = vsyncpa [#allocation6], 0 }
   0x2   :  { %17 = vsyncpa [#allocation9], 0 }
   0x3   :  { %18 = vsyncpa [#allocation12], 0 }
   0x4   :  { %19 = vsyncpa [#allocation4], 0  ;;  %s1349_s13 = smov [#allocation5]   ;;  %s1350_s15 = smov [#allocation8]  }
   0x5   :  { %s36_s14 = sshll.u32 %s1349_s13, 4  ;;  %s59_s16 = sshll.u32 %s1350_s15, 4  ;;  %s37_s14 = int_to_ptr.vmem [resolvable:$true] %s36_s14  ;;  %s1416_s16 = int_to_ptr.vmem [resolvable:$true] %s59_s16 }
   0x6   :  { %s1185_s19 = scalar_lea.hbm %s1556_s1, 64 }
   0x7   :  { %p1186_p0 = scmp.ne.s32.totalorder %s1556_s1, %s1185_s19  ;;  %p1189_p1 = scmp.lt.u32.totalorder %s1185_s19, %s1556_s1 }
   0x9   :  { %p1191_p2 = pnand %p1189_p1, %p1186_p0 }
   0xb   :  { %1194 = shalt.err (!%p1191_p2)
}
   0xc   :  { %s1195_s24 = scalar_lea.vmem %s37_s14, 64  ;;  %p1200_p4 = scmp.lt.s32.totalorder %s37_s14, %s37_s14 }
   0xd   :  { %p1196_p3 = scmp.ne.s32.totalorder %s37_s14, %s1195_s24  ;;  %p1201_p5 = scmp.lt.s32.totalorder %s1195_s24, %s1195_s24 }
   0xf   :  { %p1202_p6 = por %p1201_p5, %p1200_p4 }
  0x11   :  { %p1203_p7 = pnand %p1202_p6, %p1196_p3 }
  0x13   :  { %1206 = shalt.err (!%p1203_p7)
}
  0x14   :  { %39 = dma.hbm_to_vmem [thread:$0]  %s1556_s1, 64, %s37_s14, [#allocation6]  }
  0x15   :  { %s1207_s29 = scalar_lea.hbm %s1559_s4, 2048 }
  0x16   :  { %p1208_p8 = scmp.ne.s32.totalorder %s1559_s4, %s1207_s29  ;;  %p1211_p9 = scmp.lt.u32.totalorder %s1207_s29, %s1559_s4 }
  0x18   :  { %p1213_p10 = pnand %p1211_p9, %p1208_p8 }
  0x1a   :  { %1216 = shalt.err (!%p1213_p10)
}
  0x1b   :  { %s1217_s15 = scalar_lea.vmem %s1416_s16, 2048  ;;  %p1222_p12 = scmp.lt.s32.totalorder %s1416_s16, %s1416_s16 }
  0x1c   :  { %p1218_p11 = scmp.ne.s32.totalorder %s1416_s16, %s1217_s15  ;;  %p1223_p13 = scmp.lt.s32.totalorder %s1217_s15, %s1217_s15 }
  0x1e   :  { %p1224_p0 = por %p1223_p13, %p1222_p12 }
  0x20   :  { %p1225_p1 = pnand %p1224_p0, %p1218_p11 }
  0x22   :  { %1228 = shalt.err (!%p1225_p1)
}
  0x23   :  { %s1351_s1 = smov 64   ;;  %s1352_s14 = smov 4  }
  0x24   :  { %65 = dma.hbm_to_vmem [thread:$0]  %s1559_s4, 2048, %s1416_s16, [#allocation9], %s1351_s1, %s1351_s1, %s1352_s14  }
  0x25   :  { %s1353_s19 = smov [#allocation2]   ;;  %s1354_s21 = smov [#allocation7]  }
  0x26   :  { %s26_s20 = sshll.u32 %s1353_s19, 4  ;;  %s45_s22 = sshll.u32 %s1354_s21, 4  ;;  %s27_s20 = int_to_ptr.vmem [resolvable:$true] %s26_s20  ;;  %s1450_s22 = int_to_ptr.vmem [resolvable:$true] %s45_s22 }
  0x27   :  { %s1229_s25 = scalar_lea.hbm %s1555_s0, 32 }
  0x28   :  { %p1230_p2 = scmp.ne.s32.totalorder %s1555_s0, %s1229_s25  ;;  %p1233_p3 = scmp.lt.u32.totalorder %s1229_s25, %s1555_s0 }
  0x2a   :  { %p1235_p4 = pnand %p1233_p3, %p1230_p2 }
  0x2c   :  { %1238 = shalt.err (!%p1235_p4)
}
  0x2d   :  { %s1239_s4 = scalar_lea.vmem %s27_s20, 32  ;;  %p1244_p6 = scmp.lt.s32.totalorder %s27_s20, %s27_s20 }
  0x2e   :  { %p1240_p5 = scmp.ne.s32.totalorder %s27_s20, %s1239_s4  ;;  %p1245_p7 = scmp.lt.s32.totalorder %s1239_s4, %s1239_s4 }
  0x30   :  { %p1246_p8 = por %p1245_p7, %p1244_p6 }
  0x32   :  { %p1247_p9 = pnand %p1246_p8, %p1240_p5 }
  0x34   :  { %1250 = shalt.err (!%p1247_p9)
}
  0x35   :  { %29 = dma.hbm_to_vmem [thread:$0]  %s1555_s0, 32, %s27_s20, [#allocation3]  }
  0x36   :  { %s1251_s13 = scalar_lea.hbm %s1557_s2, 2048 }
  0x37   :  { %p1252_p10 = scmp.ne.s32.totalorder %s1557_s2, %s1251_s13  ;;  %p1255_p11 = scmp.lt.u32.totalorder %s1251_s13, %s1557_s2 }
  0x39   :  { %p1257_p12 = pnand %p1255_p11, %p1252_p10 }
  0x3b   :  { %1260 = shalt.err (!%p1257_p12)
}
  0x3c   :  { %s1261_s21 = scalar_lea.vmem %s1450_s22, 2048  ;;  %p1266_p0 = scmp.lt.s32.totalorder %s1450_s22, %s1450_s22 }
  0x3d   :  { %p1262_p13 = scmp.ne.s32.totalorder %s1450_s22, %s1261_s21  ;;  %p1267_p1 = scmp.lt.s32.totalorder %s1261_s21, %s1261_s21 }
  0x3f   :  { %p1268_p2 = por %p1267_p1, %p1266_p0 }
  0x41   :  { %p1269_p3 = pnand %p1268_p2, %p1262_p13 }
  0x43   :  { %1272 = shalt.err (!%p1269_p3)
}
  0x44   :  { %s1355_s0 = smov 128   ;;  %s1356_s20 = smov 8  }
  0x45   :  { %51 = dma.hbm_to_vmem [thread:$0]  %s1557_s2, 2048, %s1450_s22, [#allocation6], %s1355_s0, %s1355_s0, %s1356_s20  }
  0x46   :  { %s1357_s25 = smov [#allocation10]   ;;  %s1358_s27 = smov [#allocation11]  }
  0x47   :  { %s73_s26 = sshll.u32 %s1357_s25, 4  ;;  %s87_s28 = sshll.u32 %s1358_s27, 4  ;;  %s74_s26 = int_to_ptr.vmem [resolvable:$true] %s73_s26  ;;  %s1481_s28 = int_to_ptr.vmem [resolvable:$true] %s87_s28 }
  0x48   :  { %s1273_s16 = scalar_lea.hbm %s1561_s6, 4096 }
  0x49   :  { %p1274_p4 = scmp.ne.s32.totalorder %s1561_s6, %s1273_s16  ;;  %p1277_p5 = scmp.lt.u32.totalorder %s1273_s16, %s1561_s6 }
  0x4b   :  { %p1279_p6 = pnand %p1277_p5, %p1274_p4 }
  0x4d   :  { %1282 = shalt.err (!%p1279_p6)
}
  0x4e   :  { %s1283_s2 = scalar_lea.vmem %s74_s26, 4096  ;;  %p1288_p8 = scmp.lt.s32.totalorder %s74_s26, %s74_s26 }
  0x4f   :  { %p1284_p7 = scmp.ne.s32.totalorder %s74_s26, %s1283_s2  ;;  %p1289_p9 = scmp.lt.s32.totalorder %s1283_s2, %s1283_s2 }
  0x51   :  { %p1290_p10 = por %p1289_p9, %p1288_p8 }
  0x53   :  { %p1291_p11 = pnand %p1290_p10, %p1284_p7 }
  0x55   :  { %1294 = shalt.err (!%p1291_p11)
}
  0x56   :  { %79 = dma.hbm_to_vmem [thread:$0]  %s1561_s6, 4096, %s74_s26, [#allocation9], %s1355_s0, %s1355_s0, %s1356_s20  }
  0x57   :  { %s1295_s19 = scalar_lea.hbm %s1563_s8, 2048 }
  0x58   :  { %p1296_p12 = scmp.ne.s32.totalorder %s1563_s8, %s1295_s19  ;;  %p1299_p13 = scmp.lt.u32.totalorder %s1295_s19, %s1563_s8 }
  0x5a   :  { %p1301_p0 = pnand %p1299_p13, %p1296_p12 }
  0x5c   :  { %1304 = shalt.err (!%p1301_p0)
}
  0x5d   :  { %s1305_s27 = scalar_lea.vmem %s1481_s28, 2048  ;;  %p1310_p2 = scmp.lt.s32.totalorder %s1481_s28, %s1481_s28 }
  0x5e   :  { %p1306_p1 = scmp.ne.s32.totalorder %s1481_s28, %s1305_s27  ;;  %p1311_p3 = scmp.lt.s32.totalorder %s1305_s27, %s1305_s27 }
  0x60   :  { %p1312_p4 = por %p1311_p3, %p1310_p2 }
  0x62   :  { %p1313_p5 = pnand %p1312_p4, %p1306_p1 }
  0x64   :  { %1316 = shalt.err (!%p1313_p5)
}
  0x65   :  { %93 = dma.hbm_to_vmem [thread:$0]  %s1563_s8, 2048, %s1481_s28, [#allocation12], %s1351_s1, %s1351_s1, %s1352_s14  }
  0x66   :  { %1339 = dma.done.wait [#allocation3], 32  }
  0x67   :  { %1340 = vsyncadd [#allocation3], 4294967264 }
  0x68   :  { %1341 = dma.done.wait [#allocation6], 2112  }
  0x69   :  { %1342 = vsyncadd [#allocation6], 4294965184 }
  0x6a   :  { %1343 = dma.done.wait [#allocation9], 6144  }
  0x6b   :  { %1344 = vsyncadd [#allocation9], 4294961152 }
  0x6c   :  { %1345 = dma.done.wait [#allocation12], 2048  }
  0x6d   :  { %1346 = vsyncadd [#allocation12], 4294965248  ;;  %v1359_v0 = vmov 0   ;;  %v1073_v1 = vld [vmem:[#allocation7 + $0x4] ss:$8 sps:$4 sm:$0xff]   ;;  %v1149_v31 = vld [vmem:[#allocation8 + $0x50] sm:$0xff]  }
  0x6e   :  { %257 = vmatprep.mubr.bf16.mxu0 %v1359_v0  ;;  %v1075_v2 = vld [vmem:[#allocation7] ss:$8 sps:$4 sm:$0xff]   ;;  %225 = vmatprep.subr.bf16.mxu0 %v1073_v1  ;;  %v1076_v3 = vld [vmem:[#allocation7 + $0x14] ss:$8 sps:$4 sm:$0xff]   ;;  %v1078_v4 = vld [vmem:[#allocation7 + $0x10] ss:$8 sps:$4 sm:$0xff]  }
  0x6f   :  { %226 = vmatpush1.bf16.msra.mxu0 %v1075_v2  ;;  %v1079_v5 = vld [vmem:[#allocation7 + $0x24] ss:$8 sps:$4 sm:$0xff]   ;;  %v1081_v6 = vld [vmem:[#allocation7 + $0x20] ss:$8 sps:$4 sm:$0xff]   ;;  %v1082_v7 = vld [vmem:[#allocation7 + $0x34] ss:$8 sps:$4 sm:$0xff]  }
  0x70   :  { %227 = vmatprep.subr.bf16.mxu0 %v1076_v3  ;;  %v1084_v8 = vld [vmem:[#allocation7 + $0x30] ss:$8 sps:$4 sm:$0xff]   ;;  %v1085_v9 = vld [vmem:[#allocation7 + $0x44] ss:$8 sps:$4 sm:$0xff]   ;;  %v1087_v10 = vld [vmem:[#allocation7 + $0x40] ss:$8 sps:$4 sm:$0xff]  }
  0x71   :  { %v1088_v11 = vld [vmem:[#allocation7 + $0x54] ss:$8 sps:$4 sm:$0xff]   ;;  %v1090_v12 = vld [vmem:[#allocation7 + $0x50] ss:$8 sps:$4 sm:$0xff]   ;;  %v1091_v13 = vld [vmem:[#allocation7 + $0x64] ss:$8 sps:$4 sm:$0xff]  }
  0x72   :  { %v1093_v14 = vld [vmem:[#allocation7 + $0x60] ss:$8 sps:$4 sm:$0xff]   ;;  %v1094_v15 = vld [vmem:[#allocation7 + $0x74] ss:$8 sps:$4 sm:$0xff]   ;;  %v1096_v16 = vld [vmem:[#allocation7 + $0x70] ss:$8 sps:$4 sm:$0xff]  }
  0x73   :  { %228 = vmatpush1.bf16.msra.mxu0 %v1078_v4  ;;  %v115_v17 = vld [vmem:[#allocation2] sm:$0x3]  ;;  %v1099_v18 = vld [vmem:[#allocation10 + $0x4] ss:$8 sps:$4 sm:$0xff]   ;;  %v1097_v20 = vld [vmem:[#allocation10] ss:$8 sps:$4 sm:$0xff]  }
  0x74   :  { %229 = vmatprep.subr.bf16.mxu0 %v1079_v5  ;;  %v116_v19 = vpack.c.bf16 %v115_v17, %v115_v17  ;;  %v1102_v21 = vld [vmem:[#allocation10 + $0x14] ss:$8 sps:$4 sm:$0xff]   ;;  %v1100_v23 = vld [vmem:[#allocation10 + $0x10] ss:$8 sps:$4 sm:$0xff]   ;;  %v1145_v25 = vld [vmem:[#allocation8 + $0x40] sm:$0xff]   ;;  %vm887_vm1 = vcmask 1041408  }
  0x75   :  { %v1515_v22 = vld.sshfl [vmem:[#allocation5] sm:$0x33 pattern:$0x76325410]  ;;  %v1105_v26 = vld [vmem:[#allocation10 + $0x24] ss:$8 sps:$4 sm:$0xff]   ;;  %1017 = vmatprep.subr.bf16.mxu1 %v1145_v25 }
  0x76   :  { %v454_v24 = vcombine.high %v1515_v22, %v1515_v22  ;;  %v1146_v27 = vld [vmem:[#allocation8] sm:$0xff]   ;;  %v1147_v29 = vld [vmem:[#allocation8 + $0x48] sm:$0xff]   ;;  %v1108_v33 = vld [vmem:[#allocation10 + $0x34] ss:$8 sps:$4 sm:$0xff]   ;;  %v457_v2 = vpack.c.bf16 %v1515_v22, %v1515_v22 }
  0x77   :  { %230 = vmatpush1.bf16.msra.mxu0 %v1081_v6  ;;  %1018 = vmatpush3.bf16.msra.mxu1 %v1146_v27  ;;  %v1148_v30 = vld [vmem:[#allocation8 + $0x8] sm:$0xff]   ;;  %v1150_v34 = vld [vmem:[#allocation8 + $0x10] sm:$0xff]   ;;  %v1151_v35 = vld [vmem:[#allocation8 + $0x58] sm:$0xff]  }
  0x78   :  { %231 = vmatprep.subr.bf16.mxu0 %v1082_v7  ;;  %v458_v28 = vpack.c.bf16 %v454_v24, %v454_v24  ;;  %1019 = vmatprep.subr.bf16.mxu1 %v1147_v29  ;;  %v1103_v32 = vld [vmem:[#allocation10 + $0x20] ss:$8 sps:$4 sm:$0xff]   ;;  %v1106_v36 = vld [vmem:[#allocation10 + $0x30] ss:$8 sps:$4 sm:$0xff]   ;;  %v1111_v37 = vld [vmem:[#allocation10 + $0x44] ss:$8 sps:$4 sm:$0xff]  }
  0x79   :  { %v1152_v38 = vld [vmem:[#allocation8 + $0x18] sm:$0xff]   ;;  %v1109_v39 = vld [vmem:[#allocation10 + $0x40] ss:$8 sps:$4 sm:$0xff]   ;;  %v1117_v45 = vld [vmem:[#allocation10 + $0x64] ss:$8 sps:$4 sm:$0xff]  }
  0x7a   :  { %v1153_v40 = vld [vmem:[#allocation8 + $0x60] sm:$0xff]   ;;  %v1114_v41 = vld [vmem:[#allocation10 + $0x54] ss:$8 sps:$4 sm:$0xff]   ;;  %v1155_v43 = vld [vmem:[#allocation8 + $0x68] sm:$0xff]  }
  0x7b   :  { %232 = vmatpush1.bf16.msra.mxu0 %v1084_v8  ;;  %1020 = vmatpush3.bf16.msra.mxu1 %v1148_v30  ;;  %v1154_v42 = vld [vmem:[#allocation8 + $0x20] sm:$0xff]   ;;  %v1112_v44 = vld [vmem:[#allocation10 + $0x50] ss:$8 sps:$4 sm:$0xff]   ;;  %v1156_v46 = vld [vmem:[#allocation8 + $0x28] sm:$0xff]   ;;  %v135_v8 = vlaneseq }
  0x7c   :  { %233 = vmatprep.subr.bf16.mxu0 %v1085_v9  ;;  %1021 = vmatprep.subr.bf16.mxu1 %v1149_v31  ;;  %v1115_v47 = vld [vmem:[#allocation10 + $0x60] ss:$8 sps:$4 sm:$0xff]   ;;  %v1120_v48 = vld [vmem:[#allocation10 + $0x74] ss:$8 sps:$4 sm:$0xff]   ;;  %v1118_v49 = vld [vmem:[#allocation10 + $0x70] ss:$8 sps:$4 sm:$0xff]  }
  0x7d   :  { %v1123_v50 = vld [vmem:[#allocation10 + $0x84] ss:$8 sps:$4 sm:$0xff]   ;;  %v1121_v51 = vld [vmem:[#allocation10 + $0x80] ss:$8 sps:$4 sm:$0xff]   ;;  %v1126_v52 = vld [vmem:[#allocation10 + $0x94] ss:$8 sps:$4 sm:$0xff]  }
  0x7e   :  { %v1124_v53 = vld [vmem:[#allocation10 + $0x90] ss:$8 sps:$4 sm:$0xff]   ;;  %v1129_v54 = vld [vmem:[#allocation10 + $0xa4] ss:$8 sps:$4 sm:$0xff]   ;;  %v1127_v55 = vld [vmem:[#allocation10 + $0xa0] ss:$8 sps:$4 sm:$0xff]  }
  0x7f   :  { %234 = vmatpush1.bf16.msra.mxu0 %v1087_v10  ;;  %1022 = vmatpush3.bf16.msra.mxu1 %v1150_v34  ;;  %v1132_v56 = vld [vmem:[#allocation10 + $0xb4] ss:$8 sps:$4 sm:$0xff]   ;;  %v1130_v57 = vld [vmem:[#allocation10 + $0xb0] ss:$8 sps:$4 sm:$0xff]   ;;  %v1135_v58 = vld [vmem:[#allocation10 + $0xc4] ss:$8 sps:$4 sm:$0xff]  }
  0x80   :  { %235 = vmatprep.subr.bf16.mxu0 %v1088_v11  ;;  %1023 = vmatprep.subr.bf16.mxu1 %v1151_v35  ;;  %v1133_v59 = vld [vmem:[#allocation10 + $0xc0] ss:$8 sps:$4 sm:$0xff]   ;;  %v1138_v60 = vld [vmem:[#allocation10 + $0xd4] ss:$8 sps:$4 sm:$0xff]   ;;  %v1136_v61 = vld [vmem:[#allocation10 + $0xd0] ss:$8 sps:$4 sm:$0xff]  }
  0x81   :  { %v1141_v62 = vld [vmem:[#allocation10 + $0xe4] ss:$8 sps:$4 sm:$0xff]   ;;  %v1139_v63 = vld [vmem:[#allocation10 + $0xe0] ss:$8 sps:$4 sm:$0xff]   ;;  %v1144_v0 = vld [vmem:[#allocation10 + $0xf4] ss:$8 sps:$4 sm:$0xff]  }
  0x82   :  { %v1142_v1 = vld [vmem:[#allocation10 + $0xf0] ss:$8 sps:$4 sm:$0xff]   ;;  %v1161_v7 = vld [vmem:[#allocation11 + $0x40] sm:$0xff]   ;;  %v136_v9 = vshrl.u32 %v135_v8, 7  ;;  %v1164_v27 = vld [vmem:[#allocation11 + $0x8] sm:$0xff]  }
  0x83   :  { %236 = vmatpush1.bf16.msra.mxu0 %v1090_v12  ;;  %1024 = vmatpush3.bf16.msra.mxu1 %v1152_v38  ;;  %v1157_v3 = vld [vmem:[#allocation8 + $0x70] sm:$0xff]   ;;  %v1159_v5 = vld [vmem:[#allocation8 + $0x78] sm:$0xff]   ;;  %v1162_v25 = vld [vmem:[#allocation11] sm:$0xff]  }
  0x84   :  { %237 = vmatprep.subr.bf16.mxu0 %v1091_v13  ;;  %1025 = vmatprep.subr.bf16.mxu1 %v1153_v40  ;;  %v1158_v4 = vld [vmem:[#allocation8 + $0x30] sm:$0xff]   ;;  %v1160_v6 = vld [vmem:[#allocation8 + $0x38] sm:$0xff]   ;;  %v137_v10 = vsub.s32 0, %v136_v9  ;;  %v141_v12 = vsub.s32 1, %v136_v9  ;;  %v1171_v34 = vld [vmem:[#allocation11 + $0x68] sm:$0xff]  }
  0x85   :  { %v133_v11 = vld [vmem:[%s1558_s3] sm:$0x3]  ;;  %v1166_v29 = vld [vmem:[#allocation11 + $0x10] sm:$0xff]   ;;  %v1172_v35 = vld [vmem:[#allocation11 + $0x28] sm:$0xff]  }
  0x86   :  { %v138_v13 = vrot.slane %v133_v11, %v137_v10  ;;  %v1167_v30 = vld [vmem:[#allocation11 + $0x58] sm:$0xff]  }
  0x87   :  { %238 = vmatpush1.bf16.msra.mxu0 %v1093_v14  ;;  %1026 = vmatpush3.bf16.msra.mxu1 %v1154_v42  ;;  %v142_v14 = vrot.slane %v133_v11, %v141_v12  ;;  %v1168_v31 = vld [vmem:[#allocation11 + $0x18] sm:$0xff]  }
  0x88   :  { %239 = vmatprep.subr.bf16.mxu0 %v1094_v15  ;;  %1027 = vmatprep.subr.bf16.mxu1 %v1155_v43  ;;  %v1175_v38 = vld [vmem:[#allocation11 + $0x78] sm:$0xff]  }
  0x89   :  { %v491_v40 = vld [vmem:[%s1562_s7] sm:$0x3] }
  0x8a   :  { %v500_v42 = vrot.slane %v491_v40, %v141_v12 }
  0x8b   :  { %240 = vmatpush1.bf16.msra.mxu0 %v1096_v16  ;;  %1028 = vmatpush3.bf16.msra.mxu1 %v1156_v46 }
  0x8c   :  { %663 = vmatprep.subr.bf16.mxu0 %v1099_v18  ;;  %1029 = vmatprep.subr.bf16.mxu1 %v1157_v3 }
  0x8e   :  { %258 = vmatmul.mubr.bf16.vlgmr.msra.gmra.mrb[0].mxu0 %v116_v19 }
  0x8f   :  { %664 = vmatpush1.bf16.msra.mxu0 %v1097_v20  ;;  %695 = vmatprep.mubr.bf16.mxu0 %v458_v28  ;;  %v1165_v28 = vld [vmem:[#allocation11 + $0x50] sm:$0xff]  }
  0x90   :  { %665 = vmatprep.subr.bf16.mxu0 %v1102_v21  ;;  %1030 = vmatpush3.bf16.msra.mxu1 %v1158_v4 }
  0x91   :  { %1031 = vmatprep.subr.bf16.mxu1 %v1159_v5 }
  0x93   :  { %666 = vmatpush1.bf16.msra.mxu0 %v1100_v23 }
  0x94   :  { %667 = vmatprep.subr.bf16.mxu0 %v1105_v26  ;;  %1032 = vmatpush3.bf16.msra.mxu1 %v1160_v6  ;;  %v1163_v26 = vld [vmem:[#allocation11 + $0x48] sm:$0xff]  }
  0x95   :  { %1039 = vmatprep.subr.bf16.mxu1 %v1161_v7 }
  0x97   :  { %668 = vmatpush1.bf16.msra.mxu0 %v1103_v32  ;;  %v1169_v32 = vld [vmem:[#allocation11 + $0x60] sm:$0xff]  }
  0x98   :  { %669 = vmatprep.subr.bf16.mxu0 %v1108_v33  ;;  %v1170_v33 = vld [vmem:[#allocation11 + $0x20] sm:$0xff]  }
  0x9b   :  { %670 = vmatpush1.bf16.msra.mxu0 %v1106_v36  ;;  %v1173_v36 = vld [vmem:[#allocation11 + $0x70] sm:$0xff]  }
  0x9c   :  { %671 = vmatprep.subr.bf16.mxu0 %v1111_v37  ;;  %v1174_v37 = vld [vmem:[#allocation11 + $0x30] sm:$0xff]  }
  0x9f   :  { %672 = vmatpush1.bf16.msra.mxu0 %v1109_v39  ;;  %v1176_v39 = vld [vmem:[#allocation11 + $0x38] sm:$0xff]  }
  0xa0   :  { %673 = vmatprep.subr.bf16.mxu0 %v1114_v41  ;;  %v496_v41 = vrot.slane %v491_v40, %v137_v10 }
  0xa3   :  { %674 = vmatpush1.bf16.msra.mxu0 %v1112_v44 }
  0xa4   :  { %675 = vmatprep.subr.bf16.mxu0 %v1117_v45 }
  0xa7   :  { %676 = vmatpush1.bf16.msra.mxu0 %v1115_v47 }
  0xa8   :  { %677 = vmatprep.subr.bf16.mxu0 %v1120_v48 }
  0xab   :  { %678 = vmatpush1.bf16.msra.mxu0 %v1118_v49 }
  0xac   :  { %679 = vmatprep.subr.bf16.mxu0 %v1123_v50 }
  0xaf   :  { %680 = vmatpush1.bf16.msra.mxu0 %v1121_v51 }
  0xb0   :  { %681 = vmatprep.subr.bf16.mxu0 %v1126_v52 }
  0xb3   :  { %682 = vmatpush1.bf16.msra.mxu0 %v1124_v53  ;;  %v884_v53 = vand.u32 127, %v135_v8 }
  0xb4   :  { %683 = vmatprep.subr.bf16.mxu0 %v1129_v54 }
  0xb5   :  { %vm885_vm0 = vcmp.lt.s32.totalorder %v884_v53, 8 }
  0xb7   :  { %684 = vmatpush1.bf16.msra.mxu0 %v1127_v55  ;;  %v950_v55 = vld [vmem:[%s1560_s5] ss:$0 sm:$0xff]  ;;  %s1360_s5 = smov [#allocation13]  }
  0xb8   :  { %685 = vmatprep.subr.bf16.mxu0 %v1132_v56 }
  0xbb   :  { %686 = vmatpush1.bf16.msra.mxu0 %v1130_v57 }
  0xbc   :  { %687 = vmatprep.subr.bf16.mxu0 %v1135_v58 }
  0xbf   :  { %688 = vmatpush1.bf16.msra.mxu0 %v1133_v59 }
  0xc0   :  { %689 = vmatprep.subr.bf16.mxu0 %v1138_v60 }
  0xc3   :  { %690 = vmatpush1.bf16.msra.mxu0 %v1136_v61 }
  0xc4   :  { %691 = vmatprep.subr.bf16.mxu0 %v1141_v62 }
  0xc7   :  { %692 = vmatpush1.bf16.msra.mxu0 %v1139_v63 }
  0xc8   :  { %693 = vmatprep.subr.bf16.mxu0 %v1144_v0  ;;  %v1000_v0 = vld [vmem:[%s1564_s9] ss:$0 sm:$0xff]  ;;  %s922_s9 = sshll.u32 %s1360_s5, 4  ;;  %s923_s9 = int_to_ptr.vmem [resolvable:$true] %s922_s9 }
  0xc9   :  { %s1317_s29 = scalar_lea.vmem %s923_s9, 32  ;;  %p1322_p7 = scmp.lt.s32.totalorder %s923_s9, %s923_s9 }
  0xca   :  { %p1318_p6 = scmp.ne.s32.totalorder %s923_s9, %s1317_s29  ;;  %p1323_p8 = scmp.lt.s32.totalorder %s1317_s29, %s1317_s29 }
  0xcb   :  { %694 = vmatpush1.bf16.msra.mxu0 %v1142_v1 }
  0xcc   :  { %p1324_p9 = por %p1323_p8, %p1322_p7 }
  0xce   :  { %696 = vmatmul.mubr.bf16.vlgmr.msra.gmra.mrb[4].mxu0 %v457_v2  ;;  %p1325_p10 = pnand %p1324_p9, %p1318_p6 }
 0x161   :  { %v259_v15 = vpop.f32.mrb[0].mxu0 }
 0x162   :  { %v260_v16 = vadd.f32 %v259_v15, %v138_v13  ;;  %v261_v17 = vpop.f32.mrb[1].mxu0 }
 0x163   :  { %v262_v18 = vadd.f32 %v261_v17, %v142_v14  ;;  %v263_v19 = vpop.f32.mrb[2].mxu0 }
 0x164   :  { %v266_v20 = vmax.f32 %v260_v16, 0.0  ;;  %v264_v21 = vpop.f32.mrb[3].mxu0 }
 0x165   :  { %v267_v22 = vmax.f32 %v262_v18, 0.0 }
 0x166   :  { %v268_v23 = vpack.c.bf16 %v266_v20, %v266_v20 }
 0x167   :  { %v269_v24 = vpack.c.bf16 %v267_v22, %v267_v22 }
 0x169   :  { %437 = vmatprep.mubr.bf16.mxu1 %v269_v24 }
 0x16a   :  { %438 = vmatmul.mubr.bf16.vlgmr.msra.gmra.mrb[0].mxu1 %v268_v23 }
 0x16b   :  { %1040 = vmatpush3.bf16.msra.mxu1 %v1162_v25 }
 0x16c   :  { %1041 = vmatprep.subr.bf16.mxu1 %v1163_v26 }
 0x16f   :  { %1042 = vmatpush3.bf16.msra.mxu1 %v1164_v27 }
 0x170   :  { %1043 = vmatprep.subr.bf16.mxu1 %v1165_v28 }
 0x173   :  { %1044 = vmatpush3.bf16.msra.mxu1 %v1166_v29 }
 0x174   :  { %1045 = vmatprep.subr.bf16.mxu1 %v1167_v30 }
 0x177   :  { %1046 = vmatpush3.bf16.msra.mxu1 %v1168_v31 }
 0x178   :  { %1047 = vmatprep.subr.bf16.mxu1 %v1169_v32 }
 0x17b   :  { %1048 = vmatpush3.bf16.msra.mxu1 %v1170_v33 }
 0x17c   :  { %1049 = vmatprep.subr.bf16.mxu1 %v1171_v34 }
 0x17f   :  { %1050 = vmatpush3.bf16.msra.mxu1 %v1172_v35 }
 0x180   :  { %1051 = vmatprep.subr.bf16.mxu1 %v1173_v36 }
 0x183   :  { %1052 = vmatpush3.bf16.msra.mxu1 %v1174_v37 }
 0x184   :  { %1053 = vmatprep.subr.bf16.mxu1 %v1175_v38 }
 0x187   :  { %1054 = vmatpush3.bf16.msra.mxu1 %v1176_v39 }
 0x1a1   :  { %v697_v43 = vpop.f32.mrb[4].mxu0 }
 0x1a2   :  { %v698_v44 = vadd.f32 %v697_v43, %v496_v41  ;;  %v699_v45 = vpop.f32.mrb[5].mxu0 }
 0x1a3   :  { %v700_v46 = vadd.f32 %v699_v45, %v500_v42  ;;  %v701_v47 = vpop.f32.mrb[6].mxu0 }
 0x1a4   :  { %v704_v48 = vmax.f32 %v698_v44, 0.0  ;;  %v702_v49 = vpop.f32.mrb[7].mxu0 }
 0x1a5   :  { %v705_v50 = vmax.f32 %v700_v46, 0.0 }
 0x1a6   :  { %v706_v52 = vpack.c.bf16 %v704_v48, %v704_v48 }
 0x1a7   :  { %v707_v51 = vpack.c.bf16 %v705_v50, %v705_v50 }
 0x1a9   :  { %875 = vmatprep.mubr.bf16.mxu1 %v707_v51 }
 0x1aa   :  { %876 = vmatmul.mubr.bf16.vlgmr.msra.gmra.mrb[4].mxu1 %v706_v52 }
 0x23d   :  { %v1033_v54 = vpop.f32.mrb[0].mxu1 }
 0x23e   :  { %v1034_v56 = vpop.f32.mrb[1].mxu1 }
 0x23f   :  { %v1035_v57 = vadd.f32 %v1034_v56, %v1033_v54  ;;  %v1036_v58 = vpop.f32.mrb[2].mxu1 }
 0x240   :  { %v1037_v59 = vpop.f32.mrb[3].mxu1 }
 0x241   :  { %v440_v60 = vadd.f32 %v1035_v57, %v950_v55 }
 0x243   :  { %v886_v61 = vsel %vm885_vm0, %v440_v60, -1e+30 }
 0x244   :  { %v888_v62 = vsel %vm887_vm1, %v886_v61, -inf }
 0x245   :  { %889 = vmax.xlane.f32.xlu0 %v888_v62 }
 0x27d   :  { %v1055_v63 = vpop.f32.mrb[4].mxu1 }
 0x27e   :  { %v1056_v1 = vpop.f32.mrb[5].mxu1 }
 0x27f   :  { %v1057_v2 = vadd.f32 %v1056_v1, %v1055_v63  ;;  %v1058_v3 = vpop.f32.mrb[6].mxu1 }
 0x280   :  { %v1059_v4 = vpop.f32.mrb[7].mxu1 }
 0x281   :  { %v878_v5 = vadd.f32 %v1057_v2, %v1000_v0 }
 0x283   :  { %v900_v6 = vsel %vm885_vm0, %v878_v5, -1e+30 }
 0x284   :  { %v901_v7 = vsel %vm887_vm1, %v900_v6, -inf }
 0x285   :  { %902 = vmax.xlane.f32.xlu0 %v901_v7 }
 0x2d2   :  { %v890_v8 = vpop.xlane.xlu0 %889 }
 0x2d3   :  { %v891_v9 = vsub.f32 %v886_v61, %v890_v8 }
 0x2d5   :  { %v892_v10 = vmul.f32 1.442695, %v891_v9 }
 0x2d7   :  { %1177 = vpow2.f32 %v892_v10 }
 0x2e1   :  { %v1178_v11 = vpop.eup %1177 }
 0x2e2   :  { %v894_v12 = vsel %vm885_vm0, %v1178_v11, 0.0 }
 0x2e3   :  { %v895_v13 = vsel %vm887_vm1, %v894_v12, 0.0 }
 0x2e4   :  { %896 = vadd.xlane.f32.xlu1 %v895_v13 }
 0x312   :  { %v903_v14 = vpop.xlane.xlu0 %902 }
 0x313   :  { %v904_v15 = vsub.f32 %v900_v6, %v903_v14 }
 0x315   :  { %v905_v16 = vmul.f32 1.442695, %v904_v15 }
 0x317   :  { %1179 = vpow2.f32 %v905_v16 }
 0x321   :  { %v1180_v17 = vpop.eup %1179 }
 0x322   :  { %v907_v18 = vsel %vm885_vm0, %v1180_v17, 0.0 }
 0x323   :  { %v908_v19 = vsel %vm887_vm1, %v907_v18, 0.0 }
 0x324   :  { %909 = vadd.xlane.f32.xlu1 %v908_v19 }
 0x371   :  { %v897_v20 = vpop.xlane.xlu1 %896 }
 0x372   :  { %1181 = vrcp.f32 %v897_v20 }
 0x37c   :  { %v1182_v22 = vpop.eup %1181 }
 0x37d   :  { %v899_v24 = vmul.f32 %v1182_v22, %v894_v12 }
 0x3b1   :  { %v910_v21 = vpop.xlane.xlu1 %909 }
 0x3b2   :  { %1183 = vrcp.f32 %v910_v21 }
 0x3bc   :  { %v1184_v23 = vpop.eup %1183 }
 0x3bd   :  { %v912_v25 = vmul.f32 %v1184_v23, %v907_v18 }
 0x3bf   :  { %v913_v26 = vadd.f32 %v912_v25, %v899_v24 }
 0x3c1   :  { %v914_v27 = vmul.f32 0.5, %v913_v26 }
 0x3c3   :  { %915 = vst [vmem:[#allocation13] sm:$0x3] %v914_v27 }
 0x3c4   :  { %1328 = shalt.err (!%p1325_p10)
}
 0x3c5   :  { %s1329_s30 = scalar_lea.hbm %s1565_s10, 32 }
 0x3c6   :  { %p1330_p11 = scmp.ne.s32.totalorder %s1565_s10, %s1329_s30  ;;  %p1333_p12 = scmp.lt.u32.totalorder %s1329_s30, %s1565_s10 }
 0x3c8   :  { %p1335_p13 = pnand %p1333_p12, %p1330_p11 }
 0x3ca   :  { %1338 = shalt.err (!%p1335_p13)
}
 0x3cb   :  { %925 = dma.vmem_to_hbm [thread:$0]  %s923_s9, 32, %s1565_s10, [#allocation4]  }
 0x3cc   :  { %1347 = dma.done.wait [#allocation4], 32  }
 0x3cd   :  { %1348 = vsyncadd [#allocation4], 4294967264 }
 0x3ce   :  { %929 = vsyncpa [#allocation3], 1 }
 0x3cf   :  { %930 = vsyncpa [#allocation6], 1 }
 0x3d0   :  { %931 = vsyncpa [#allocation9], 1 }
 0x3d1   :  { %932 = vsyncpa [#allocation12], 1 }
 0x3d2   :  { %933 = vsyncpa [#allocation4], 1 }

</bundles_post_ra>
